<compile_context>
chip_gen: v7x
topology: tpu7x:2x2x1
jax: 0.10.0
libtpu: 0.0.40
codegen_flags: <defaults>
</compile_context>

<pallas_src>
import math
import jax
import jax.numpy as jnp
from jax.experimental import pallas as pl
from jax.experimental.pallas import tpu as pltpu

# -------- small config consistent with the module structure ----------------
D_MODEL = 32          # d_model
HEADS = 4             # heads
D_K = 8               # d_k
D_FF = 4 * D_MODEL    # d_ff
BATCH = 2             # batch_size
SEQ = 8               # sequence length

_INV_SQRT_DK = 1.0 / math.sqrt(D_K)
_INV_SQRT2 = 1.0 / math.sqrt(2.0)


# ------------------------- single fused Pallas kernel ------------------------
def _transformer_kernel(x_ref, mask_ref, w_q_ref, w_o_ref, w_fc1_ref, w_fc2_ref,
                        vec_ref, out_ref, attn_ref):
    """Whole batch: SelfAttention (+residual+LayerNorm) then FedForward."""
    x = x_ref[...]                                     # (B*S, D), also the residual
    pad = mask_ref[...] != 0.0                         # (B*S, S) bool pad mask

    vecs = vec_ref[...]                                # (8, 128) packed vectors
    b_q = vecs[0:1, :HEADS * D_K]                      # (1, H*d_k)
    b_o = vecs[1:2, :D_MODEL]                          # (1, D)
    ln_g = vecs[2:3, :D_MODEL]
    ln_b = vecs[3:4, :D_MODEL]
    b_fc1 = vecs[4:5, :D_FF]
    b_fc2 = vecs[5:6, :D_MODEL]

    # q = k = v = w_q(x): the PyTorch forward reuses w_q for all three.
    # One MXU push for the whole batch.
    qkv = jnp.dot(x, w_q_ref[...],
                  preferred_element_type=jnp.float32) + b_q       # (B*S, H*d_k)

    ctx_rows = []
    attn_rows = []
    for b in range(BATCH):                             # static unroll (B = 2)
        qkv_b = qkv[b * SEQ:(b + 1) * SEQ, :]          # (S, H*d_k)
        pad_b = pad[b * SEQ:(b + 1) * SEQ, :]          # (S, S)

        # 1) all independent score matmuls first (back-to-back MXU pushes)
        scores = []
        for h in range(HEADS):
            q_h = qkv_b[:, h * D_K:(h + 1) * D_K]      # (S, d_k); k == v == q
            s_h = jax.lax.dot_general(
                q_h, q_h, (((1,), (1,)), ((), ())),
                preferred_element_type=jnp.float32) * _INV_SQRT_DK
            # exact masked_fill_(-1e9)
            scores.append(jnp.where(pad_b, jnp.float32(-1.0e9), s_h))

        # 2) all softmaxes (VPU/EUP work, hides the MXU drain)
        attns = []
        for h in range(HEADS):
            m = jnp.max(scores[h], axis=-1, keepdims=True)
            e = jnp.exp(scores[h] - m)
            s = jnp.sum(e, axis=-1, keepdims=True)
            attns.append(e / s)                        # exact division

        # 3) all context matmuls; lane-concat heads into one (S, H*d_k) tile
        ctxs = [jnp.dot(attns[h], qkv_b[:, h * D_K:(h + 1) * D_K],
                        preferred_element_type=jnp.float32)
                for h in range(HEADS)]
        ctx_rows.append(jnp.concatenate(ctxs, axis=-1))     # (S, H*d_k)
        attn_rows.append(jnp.concatenate(attns, axis=-1))   # (S, H*S)

    ctx = jnp.concatenate(ctx_rows, axis=0)            # (B*S, H*d_k)

    # single output-projection matmul (equivalent to concat-heads + Linear)
    proj = jnp.dot(ctx, w_o_ref[...],
                   preferred_element_type=jnp.float32) + b_o      # (B*S, D)

    # add & LayerNorm (eps = 1e-5; fresh nn.LayerNorm -> gamma=1, beta=0)
    y = proj + x
    mean = jnp.mean(y, axis=-1, keepdims=True)
    var = jnp.mean((y - mean) ** 2, axis=-1, keepdims=True)
    out1 = (y - mean) * jax.lax.rsqrt(var + 1e-5) * ln_g + ln_b

    # FedForward: fc2(gelu(fc1(out1))), exact erf gelu.
    h1 = jnp.dot(out1, w_fc1_ref[...],
                 preferred_element_type=jnp.float32) + b_fc1       # (B*S, d_ff)
    h1 = h1 * 0.5 * (1.0 + jax.lax.erf(h1 * _INV_SQRT2))
    out2 = jnp.dot(h1, w_fc2_ref[...],
                   preferred_element_type=jnp.float32) + b_fc2     # (B*S, D)

    # single lane-dense stores
    out_ref[...] = out2
    attn_ref[...] = jnp.concatenate(attn_rows, axis=0)             # (B*S, H*S)


# ------------------------------ forward pass --------------------------------
def transformer_forward(x, attn_pad_mask, params):
    """x: (B, S, D_MODEL) float32; attn_pad_mask: (B, S, S) float32 (1.0 = pad)."""
    B, S, D = x.shape
    x2d = x.reshape(B * S, D)
    mask2d = attn_pad_mask.reshape(B * S, S).astype(jnp.float32)

    def full(shape):  # whole small array resident in VMEM, single grid step
        return pl.BlockSpec(shape, lambda i: (0, 0))

    out2d, attn2d = pl.pallas_call(
        _transformer_kernel,
        grid=(1,),                                     # one step: whole batch
        in_specs=[
            full((B * S, D)),                          # x (entire batch)
            full((B * S, S)),                          # pad mask (entire batch)
            full((D, HEADS * D_K)),                    # w_q
            full((HEADS * D_K, D)),                    # w_o
            full((D, D_FF)),                           # w_fc1
            full((D_FF, D)),                           # w_fc2
            full((8, 128)),                            # packed bias/scale vectors
        ],
        out_specs=[
            full((B * S, D)),                          # out
            full((B * S, HEADS * S)),                  # attn (lane-dense layout)
        ],
        out_shape=[
            jax.ShapeDtypeStruct((B * S, D), jnp.float32),
            jax.ShapeDtypeStruct((B * S, HEADS * S), jnp.float32),
        ],
        compiler_params=pltpu.CompilerParams(
            dimension_semantics=("arbitrary",)),
    )(x2d, mask2d,
      params["w_q"], params["w_o"], params["w_fc1"], params["w_fc2"],
      params["vec_pack"])

    out = out2d.reshape(B, S, D)
    # undo the lane-dense attention layout: (B*S, H*S) -> (B, H, S, S)
    attn = attn2d.reshape(B, S, HEADS, S).transpose(0, 2, 1, 3)
    return out, attn


# ------------------------------ parameters ----------------------------------
def _init_linear(key, fan_in, fan_out):
    # PyTorch nn.Linear default: U(-1/sqrt(fan_in), 1/sqrt(fan_in)); stored (in, out)
    k1, k2 = jax.random.split(key)
    bound = 1.0 / math.sqrt(fan_in)
    w = jax.random.uniform(k1, (fan_in, fan_out), jnp.float32, -bound, bound)
    b = jax.random.uniform(k2, (fan_out,), jnp.float32, -bound, bound)
    return w, b


def _pack_vectors(b_q, b_o, ln_g, ln_b, b_fc1, b_fc2):
    """Pack the six small vectors into one (8, 128) VMEM tile (one operand)."""
    pack = jnp.zeros((8, 128), jnp.float32)
    pack = pack.at[0, :b_q.shape[0]].set(b_q)
    pack = pack.at[1, :b_o.shape[0]].set(b_o)
    pack = pack.at[2, :ln_g.shape[0]].set(ln_g)
    pack = pack.at[3, :ln_b.shape[0]].set(ln_b)
    pack = pack.at[4, :b_fc1.shape[0]].set(b_fc1)
    pack = pack.at[5, :b_fc2.shape[0]].set(b_fc2)
    return pack


def init_params(key):
    ks = jax.random.split(key, 4)
    w_q, b_q = _init_linear(ks[0], D_MODEL, HEADS * D_K)
    w_o, b_o = _init_linear(ks[1], HEADS * D_K, D_MODEL)   # Linear created in forward
    w_fc1, b_fc1 = _init_linear(ks[2], D_MODEL, D_FF)
    w_fc2, b_fc2 = _init_linear(ks[3], D_FF, D_MODEL)
    # Fresh nn.LayerNorm(d_model): weight = 1, bias = 0
    ln_g = jnp.ones((D_MODEL,), jnp.float32)
    ln_b = jnp.zeros((D_MODEL,), jnp.float32)
    # NOTE: w_k / w_v exist in __init__ but are never used by the forward pass.
    vec_pack = _pack_vectors(b_q, b_o, ln_g, ln_b, b_fc1, b_fc2)
    return dict(w_q=w_q, w_o=w_o, w_fc1=w_fc1, w_fc2=w_fc2, vec_pack=vec_pack)


# --------------------------------- main --------------------------------------
if __name__ == "__main__":
    key = jax.random.PRNGKey(0)
    kx, kp = jax.random.split(key)

    x = jax.random.normal(kx, (BATCH, SEQ, D_MODEL), jnp.float32)

    # pad mask: last 2 key positions of every sequence are padding (True -> 1.0)
    pad = jnp.zeros((BATCH, SEQ), jnp.float32).at[:, -2:].set(1.0)
    attn_pad_mask = jnp.broadcast_to(pad[:, None, :], (BATCH, SEQ, SEQ)).astype(jnp.float32)

    params = init_params(kp)

    out, attn = jax.jit(transformer_forward)(x, attn_pad_mask, params)
    jax.block_until_ready((out, attn))

    assert out.shape == (BATCH, SEQ, D_MODEL)
    assert attn.shape == (BATCH, HEADS, SEQ, SEQ)
    print("KERNEL_OK")
</pallas_src>

<mosaic_0001>
module attributes {stable_mosaic.version = 11 : i64} {
  func.func @_transformer_kernel(%arg0: i32, %arg1: memref<16x32xf32, #tpu.memory_space<vmem>>, %arg2: memref<16x8xf32, #tpu.memory_space<vmem>>, %arg3: memref<32x32xf32, #tpu.memory_space<vmem>>, %arg4: memref<32x32xf32, #tpu.memory_space<vmem>>, %arg5: memref<32x128xf32, #tpu.memory_space<vmem>>, %arg6: memref<128x32xf32, #tpu.memory_space<vmem>>, %arg7: memref<8x128xf32, #tpu.memory_space<vmem>>, %arg8: memref<16x32xf32, #tpu.memory_space<vmem>>, %arg9: memref<16x32xf32, #tpu.memory_space<vmem>>) attributes {dimension_semantics = [#tpu.dimension_semantics<arbitrary>], iteration_bounds = array<i64: 1>, scalar_prefetch = 0 : i64, scratch_operands = 0 : i64, tpu.core_type = #tpu.core_type<tc>, window_params = [{pipeline_mode = #tpu.pipeline_mode<synchronous>, transform_indices = @transform_0, window_bounds = array<i64: 16, 32>}, {pipeline_mode = #tpu.pipeline_mode<synchronous>, transform_indices = @transform_1, window_bounds = array<i64: 16, 8>}, {pipeline_mode = #tpu.pipeline_mode<synchronous>, transform_indices = @transform_2, window_bounds = array<i64: 32, 32>}, {pipeline_mode = #tpu.pipeline_mode<synchronous>, transform_indices = @transform_3, window_bounds = array<i64: 32, 32>}, {pipeline_mode = #tpu.pipeline_mode<synchronous>, transform_indices = @transform_4, window_bounds = array<i64: 32, 128>}, {pipeline_mode = #tpu.pipeline_mode<synchronous>, transform_indices = @transform_5, window_bounds = array<i64: 128, 32>}, {pipeline_mode = #tpu.pipeline_mode<synchronous>, transform_indices = @transform_6, window_bounds = array<i64: 8, 128>}, {pipeline_mode = #tpu.pipeline_mode<synchronous>, transform_indices = @transform_7, window_bounds = array<i64: 16, 32>}, {pipeline_mode = #tpu.pipeline_mode<synchronous>, transform_indices = @transform_8, window_bounds = array<i64: 16, 32>}]} {
    %c0 = arith.constant 0 : index
    %c0_0 = arith.constant 0 : index
    %0 = vector.load %arg1[%c0, %c0_0] : memref<16x32xf32, #tpu.memory_space<vmem>>, vector<16x32xf32>
    %c0_1 = arith.constant 0 : index
    %c0_2 = arith.constant 0 : index
    %1 = vector.load %arg2[%c0_1, %c0_2] : memref<16x8xf32, #tpu.memory_space<vmem>>, vector<16x8xf32>
    %cst = arith.constant 0.000000e+00 : f32
    %2 = vector.broadcast %cst : f32 to vector<16x8xf32>
    %3 = arith.cmpf one, %1, %2 : vector<16x8xf32>
    %c0_3 = arith.constant 0 : index
    %c0_4 = arith.constant 0 : index
    %4 = vector.load %arg7[%c0_3, %c0_4] : memref<8x128xf32, #tpu.memory_space<vmem>>, vector<8x128xf32>
    %5 = vector.extract_strided_slice %4 {offsets = [0, 0], sizes = [1, 32], strides = [1, 1]} : vector<8x128xf32> to vector<1x32xf32>
    %6 = vector.extract_strided_slice %4 {offsets = [1, 0], sizes = [1, 32], strides = [1, 1]} : vector<8x128xf32> to vector<1x32xf32>
    %7 = vector.extract_strided_slice %4 {offsets = [2, 0], sizes = [1, 32], strides = [1, 1]} : vector<8x128xf32> to vector<1x32xf32>
    %8 = vector.extract_strided_slice %4 {offsets = [3, 0], sizes = [1, 32], strides = [1, 1]} : vector<8x128xf32> to vector<1x32xf32>
    %9 = vector.extract_strided_slice %4 {offsets = [4, 0], sizes = [1, 128], strides = [1, 1]} : vector<8x128xf32> to vector<1x128xf32>
    %10 = vector.extract_strided_slice %4 {offsets = [5, 0], sizes = [1, 32], strides = [1, 1]} : vector<8x128xf32> to vector<1x32xf32>
    %c0_5 = arith.constant 0 : index
    %c0_6 = arith.constant 0 : index
    %11 = vector.load %arg3[%c0_5, %c0_6] : memref<32x32xf32, #tpu.memory_space<vmem>>, vector<32x32xf32>
    %cst_7 = arith.constant dense<0.000000e+00> : vector<16x32xf32>
    %12 = tpu.matmul %0, %11, %cst_7 {dimension_numbers = #tpu.dot_dimension_numbers<[1], [0], [0], [1], [0, 0, 1, 1], [], []>} : vector<16x32xf32>, vector<32x32xf32>, vector<16x32xf32> -> vector<16x32xf32>
    %13 = vector.broadcast %5 : vector<1x32xf32> to vector<16x32xf32>
    %14 = arith.addf %12, %13 : vector<16x32xf32>
    %15 = vector.extract_strided_slice %14 {offsets = [0, 0], sizes = [8, 32], strides = [1, 1]} : vector<16x32xf32> to vector<8x32xf32>
    %16 = vector.extract_strided_slice %3 {offsets = [0, 0], sizes = [8, 8], strides = [1, 1]} : vector<16x8xi1> to vector<8x8xi1>
    %17 = vector.extract_strided_slice %15 {offsets = [0, 0], sizes = [8, 8], strides = [1, 1]} : vector<8x32xf32> to vector<8x8xf32>
    %cst_8 = arith.constant dense<0.000000e+00> : vector<8x8xf32>
    %18 = tpu.matmul %17, %17, %cst_8 {dimension_numbers = #tpu.dot_dimension_numbers<[1], [1], [0], [0], [0, 0, 1, 0], [], []>} : vector<8x8xf32>, vector<8x8xf32>, vector<8x8xf32> -> vector<8x8xf32>
    %cst_9 = arith.constant 0.353553385 : f32
    %19 = vector.broadcast %cst_9 : f32 to vector<8x8xf32>
    %20 = arith.mulf %18, %19 : vector<8x8xf32>
    %cst_10 = arith.constant -1.000000e+09 : f32
    %21 = vector.broadcast %cst_10 : f32 to vector<8x8xf32>
    %22 = arith.select %16, %21, %20 : vector<8x8xi1>, vector<8x8xf32>
    %23 = vector.extract_strided_slice %15 {offsets = [0, 8], sizes = [8, 8], strides = [1, 1]} : vector<8x32xf32> to vector<8x8xf32>
    %cst_11 = arith.constant dense<0.000000e+00> : vector<8x8xf32>
    %24 = tpu.matmul %23, %23, %cst_11 {dimension_numbers = #tpu.dot_dimension_numbers<[1], [1], [0], [0], [0, 0, 1, 0], [], []>} : vector<8x8xf32>, vector<8x8xf32>, vector<8x8xf32> -> vector<8x8xf32>
    %cst_12 = arith.constant 0.353553385 : f32
    %25 = vector.broadcast %cst_12 : f32 to vector<8x8xf32>
    %26 = arith.mulf %24, %25 : vector<8x8xf32>
    %cst_13 = arith.constant -1.000000e+09 : f32
    %27 = vector.broadcast %cst_13 : f32 to vector<8x8xf32>
    %28 = arith.select %16, %27, %26 : vector<8x8xi1>, vector<8x8xf32>
    %29 = vector.extract_strided_slice %15 {offsets = [0, 16], sizes = [8, 8], strides = [1, 1]} : vector<8x32xf32> to vector<8x8xf32>
    %cst_14 = arith.constant dense<0.000000e+00> : vector<8x8xf32>
    %30 = tpu.matmul %29, %29, %cst_14 {dimension_numbers = #tpu.dot_dimension_numbers<[1], [1], [0], [0], [0, 0, 1, 0], [], []>} : vector<8x8xf32>, vector<8x8xf32>, vector<8x8xf32> -> vector<8x8xf32>
    %cst_15 = arith.constant 0.353553385 : f32
    %31 = vector.broadcast %cst_15 : f32 to vector<8x8xf32>
    %32 = arith.mulf %30, %31 : vector<8x8xf32>
    %cst_16 = arith.constant -1.000000e+09 : f32
    %33 = vector.broadcast %cst_16 : f32 to vector<8x8xf32>
    %34 = arith.select %16, %33, %32 : vector<8x8xi1>, vector<8x8xf32>
    %35 = vector.extract_strided_slice %15 {offsets = [0, 24], sizes = [8, 8], strides = [1, 1]} : vector<8x32xf32> to vector<8x8xf32>
    %cst_17 = arith.constant dense<0.000000e+00> : vector<8x8xf32>
    %36 = tpu.matmul %35, %35, %cst_17 {dimension_numbers = #tpu.dot_dimension_numbers<[1], [1], [0], [0], [0, 0, 1, 0], [], []>} : vector<8x8xf32>, vector<8x8xf32>, vector<8x8xf32> -> vector<8x8xf32>
    %cst_18 = arith.constant 0.353553385 : f32
    %37 = vector.broadcast %cst_18 : f32 to vector<8x8xf32>
    %38 = arith.mulf %36, %37 : vector<8x8xf32>
    %cst_19 = arith.constant -1.000000e+09 : f32
    %39 = vector.broadcast %cst_19 : f32 to vector<8x8xf32>
    %40 = arith.select %16, %39, %38 : vector<8x8xi1>, vector<8x8xf32>
    %cst_20 = arith.constant dense<0xFF800000> : vector<8xf32>
    %41 = vector.multi_reduction <maximumf>, %22, %cst_20 [1] : vector<8x8xf32> to vector<8xf32>
    %42 = vector.shape_cast %41 : vector<8xf32> to vector<8x1xf32>
    %43 = vector.broadcast %42 : vector<8x1xf32> to vector<8x8xf32>
    %44 = arith.subf %22, %43 : vector<8x8xf32>
    %45 = math.exp %44 : vector<8x8xf32>
    %cst_21 = arith.constant dense<0.000000e+00> : vector<8xf32>
    %46 = vector.multi_reduction <add>, %45, %cst_21 [1] : vector<8x8xf32> to vector<8xf32>
    %47 = vector.shape_cast %46 : vector<8xf32> to vector<8x1xf32>
    %48 = vector.broadcast %47 : vector<8x1xf32> to vector<8x8xf32>
    %49 = arith.divf %45, %48 : vector<8x8xf32>
    %cst_22 = arith.constant dense<0xFF800000> : vector<8xf32>
    %50 = vector.multi_reduction <maximumf>, %28, %cst_22 [1] : vector<8x8xf32> to vector<8xf32>
    %51 = vector.shape_cast %50 : vector<8xf32> to vector<8x1xf32>
    %52 = vector.broadcast %51 : vector<8x1xf32> to vector<8x8xf32>
    %53 = arith.subf %28, %52 : vector<8x8xf32>
    %54 = math.exp %53 : vector<8x8xf32>
    %cst_23 = arith.constant dense<0.000000e+00> : vector<8xf32>
    %55 = vector.multi_reduction <add>, %54, %cst_23 [1] : vector<8x8xf32> to vector<8xf32>
    %56 = vector.shape_cast %55 : vector<8xf32> to vector<8x1xf32>
    %57 = vector.broadcast %56 : vector<8x1xf32> to vector<8x8xf32>
    %58 = arith.divf %54, %57 : vector<8x8xf32>
    %cst_24 = arith.constant dense<0xFF800000> : vector<8xf32>
    %59 = vector.multi_reduction <maximumf>, %34, %cst_24 [1] : vector<8x8xf32> to vector<8xf32>
    %60 = vector.shape_cast %59 : vector<8xf32> to vector<8x1xf32>
    %61 = vector.broadcast %60 : vector<8x1xf32> to vector<8x8xf32>
    %62 = arith.subf %34, %61 : vector<8x8xf32>
    %63 = math.exp %62 : vector<8x8xf32>
    %cst_25 = arith.constant dense<0.000000e+00> : vector<8xf32>
    %64 = vector.multi_reduction <add>, %63, %cst_25 [1] : vector<8x8xf32> to vector<8xf32>
    %65 = vector.shape_cast %64 : vector<8xf32> to vector<8x1xf32>
    %66 = vector.broadcast %65 : vector<8x1xf32> to vector<8x8xf32>
    %67 = arith.divf %63, %66 : vector<8x8xf32>
    %cst_26 = arith.constant dense<0xFF800000> : vector<8xf32>
    %68 = vector.multi_reduction <maximumf>, %40, %cst_26 [1] : vector<8x8xf32> to vector<8xf32>
    %69 = vector.shape_cast %68 : vector<8xf32> to vector<8x1xf32>
    %70 = vector.broadcast %69 : vector<8x1xf32> to vector<8x8xf32>
    %71 = arith.subf %40, %70 : vector<8x8xf32>
    %72 = math.exp %71 : vector<8x8xf32>
    %cst_27 = arith.constant dense<0.000000e+00> : vector<8xf32>
    %73 = vector.multi_reduction <add>, %72, %cst_27 [1] : vector<8x8xf32> to vector<8xf32>
    %74 = vector.shape_cast %73 : vector<8xf32> to vector<8x1xf32>
    %75 = vector.broadcast %74 : vector<8x1xf32> to vector<8x8xf32>
    %76 = arith.divf %72, %75 : vector<8x8xf32>
    %77 = vector.extract_strided_slice %15 {offsets = [0, 0], sizes = [8, 8], strides = [1, 1]} : vector<8x32xf32> to vector<8x8xf32>
    %cst_28 = arith.constant dense<0.000000e+00> : vector<8x8xf32>
    %78 = tpu.matmul %49, %77, %cst_28 {dimension_numbers = #tpu.dot_dimension_numbers<[1], [0], [0], [1], [0, 0, 1, 1], [], []>} : vector<8x8xf32>, vector<8x8xf32>, vector<8x8xf32> -> vector<8x8xf32>
    %79 = vector.extract_strided_slice %15 {offsets = [0, 8], sizes = [8, 8], strides = [1, 1]} : vector<8x32xf32> to vector<8x8xf32>
    %cst_29 = arith.constant dense<0.000000e+00> : vector<8x8xf32>
    %80 = tpu.matmul %58, %79, %cst_29 {dimension_numbers = #tpu.dot_dimension_numbers<[1], [0], [0], [1], [0, 0, 1, 1], [], []>} : vector<8x8xf32>, vector<8x8xf32>, vector<8x8xf32> -> vector<8x8xf32>
    %81 = vector.extract_strided_slice %15 {offsets = [0, 16], sizes = [8, 8], strides = [1, 1]} : vector<8x32xf32> to vector<8x8xf32>
    %cst_30 = arith.constant dense<0.000000e+00> : vector<8x8xf32>
    %82 = tpu.matmul %67, %81, %cst_30 {dimension_numbers = #tpu.dot_dimension_numbers<[1], [0], [0], [1], [0, 0, 1, 1], [], []>} : vector<8x8xf32>, vector<8x8xf32>, vector<8x8xf32> -> vector<8x8xf32>
    %83 = vector.extract_strided_slice %15 {offsets = [0, 24], sizes = [8, 8], strides = [1, 1]} : vector<8x32xf32> to vector<8x8xf32>
    %cst_31 = arith.constant dense<0.000000e+00> : vector<8x8xf32>
    %84 = tpu.matmul %76, %83, %cst_31 {dimension_numbers = #tpu.dot_dimension_numbers<[1], [0], [0], [1], [0, 0, 1, 1], [], []>} : vector<8x8xf32>, vector<8x8xf32>, vector<8x8xf32> -> vector<8x8xf32>
    %85 = tpu.concatenate %78, %80, %82, %84 in 1 : vector<8x8xf32>, vector<8x8xf32>, vector<8x8xf32>, vector<8x8xf32> -> vector<8x32xf32>
    %86 = tpu.concatenate %49, %58, %67, %76 in 1 : vector<8x8xf32>, vector<8x8xf32>, vector<8x8xf32>, vector<8x8xf32> -> vector<8x32xf32>
    %87 = vector.extract_strided_slice %14 {offsets = [8, 0], sizes = [8, 32], strides = [1, 1]} : vector<16x32xf32> to vector<8x32xf32>
    %88 = vector.extract_strided_slice %3 {offsets = [8, 0], sizes = [8, 8], strides = [1, 1]} : vector<16x8xi1> to vector<8x8xi1>
    %89 = vector.extract_strided_slice %87 {offsets = [0, 0], sizes = [8, 8], strides = [1, 1]} : vector<8x32xf32> to vector<8x8xf32>
    %cst_32 = arith.constant dense<0.000000e+00> : vector<8x8xf32>
    %90 = tpu.matmul %89, %89, %cst_32 {dimension_numbers = #tpu.dot_dimension_numbers<[1], [1], [0], [0], [0, 0, 1, 0], [], []>} : vector<8x8xf32>, vector<8x8xf32>, vector<8x8xf32> -> vector<8x8xf32>
    %cst_33 = arith.constant 0.353553385 : f32
    %91 = vector.broadcast %cst_33 : f32 to vector<8x8xf32>
    %92 = arith.mulf %90, %91 : vector<8x8xf32>
    %cst_34 = arith.constant -1.000000e+09 : f32
    %93 = vector.broadcast %cst_34 : f32 to vector<8x8xf32>
    %94 = arith.select %88, %93, %92 : vector<8x8xi1>, vector<8x8xf32>
    %95 = vector.extract_strided_slice %87 {offsets = [0, 8], sizes = [8, 8], strides = [1, 1]} : vector<8x32xf32> to vector<8x8xf32>
    %cst_35 = arith.constant dense<0.000000e+00> : vector<8x8xf32>
    %96 = tpu.matmul %95, %95, %cst_35 {dimension_numbers = #tpu.dot_dimension_numbers<[1], [1], [0], [0], [0, 0, 1, 0], [], []>} : vector<8x8xf32>, vector<8x8xf32>, vector<8x8xf32> -> vector<8x8xf32>
    %cst_36 = arith.constant 0.353553385 : f32
    %97 = vector.broadcast %cst_36 : f32 to vector<8x8xf32>
    %98 = arith.mulf %96, %97 : vector<8x8xf32>
    %cst_37 = arith.constant -1.000000e+09 : f32
    %99 = vector.broadcast %cst_37 : f32 to vector<8x8xf32>
    %100 = arith.select %88, %99, %98 : vector<8x8xi1>, vector<8x8xf32>
    %101 = vector.extract_strided_slice %87 {offsets = [0, 16], sizes = [8, 8], strides = [1, 1]} : vector<8x32xf32> to vector<8x8xf32>
    %cst_38 = arith.constant dense<0.000000e+00> : vector<8x8xf32>
    %102 = tpu.matmul %101, %101, %cst_38 {dimension_numbers = #tpu.dot_dimension_numbers<[1], [1], [0], [0], [0, 0, 1, 0], [], []>} : vector<8x8xf32>, vector<8x8xf32>, vector<8x8xf32> -> vector<8x8xf32>
    %cst_39 = arith.constant 0.353553385 : f32
    %103 = vector.broadcast %cst_39 : f32 to vector<8x8xf32>
    %104 = arith.mulf %102, %103 : vector<8x8xf32>
    %cst_40 = arith.constant -1.000000e+09 : f32
    %105 = vector.broadcast %cst_40 : f32 to vector<8x8xf32>
    %106 = arith.select %88, %105, %104 : vector<8x8xi1>, vector<8x8xf32>
    %107 = vector.extract_strided_slice %87 {offsets = [0, 24], sizes = [8, 8], strides = [1, 1]} : vector<8x32xf32> to vector<8x8xf32>
    %cst_41 = arith.constant dense<0.000000e+00> : vector<8x8xf32>
    %108 = tpu.matmul %107, %107, %cst_41 {dimension_numbers = #tpu.dot_dimension_numbers<[1], [1], [0], [0], [0, 0, 1, 0], [], []>} : vector<8x8xf32>, vector<8x8xf32>, vector<8x8xf32> -> vector<8x8xf32>
    %cst_42 = arith.constant 0.353553385 : f32
    %109 = vector.broadcast %cst_42 : f32 to vector<8x8xf32>
    %110 = arith.mulf %108, %109 : vector<8x8xf32>
    %cst_43 = arith.constant -1.000000e+09 : f32
    %111 = vector.broadcast %cst_43 : f32 to vector<8x8xf32>
    %112 = arith.select %88, %111, %110 : vector<8x8xi1>, vector<8x8xf32>
    %cst_44 = arith.constant dense<0xFF800000> : vector<8xf32>
    %113 = vector.multi_reduction <maximumf>, %94, %cst_44 [1] : vector<8x8xf32> to vector<8xf32>
    %114 = vector.shape_cast %113 : vector<8xf32> to vector<8x1xf32>
    %115 = vector.broadcast %114 : vector<8x1xf32> to vector<8x8xf32>
    %116 = arith.subf %94, %115 : vector<8x8xf32>
    %117 = math.exp %116 : vector<8x8xf32>
    %cst_45 = arith.constant dense<0.000000e+00> : vector<8xf32>
    %118 = vector.multi_reduction <add>, %117, %cst_45 [1] : vector<8x8xf32> to vector<8xf32>
    %119 = vector.shape_cast %118 : vector<8xf32> to vector<8x1xf32>
    %120 = vector.broadcast %119 : vector<8x1xf32> to vector<8x8xf32>
    %121 = arith.divf %117, %120 : vector<8x8xf32>
    %cst_46 = arith.constant dense<0xFF800000> : vector<8xf32>
    %122 = vector.multi_reduction <maximumf>, %100, %cst_46 [1] : vector<8x8xf32> to vector<8xf32>
    %123 = vector.shape_cast %122 : vector<8xf32> to vector<8x1xf32>
    %124 = vector.broadcast %123 : vector<8x1xf32> to vector<8x8xf32>
    %125 = arith.subf %100, %124 : vector<8x8xf32>
    %126 = math.exp %125 : vector<8x8xf32>
    %cst_47 = arith.constant dense<0.000000e+00> : vector<8xf32>
    %127 = vector.multi_reduction <add>, %126, %cst_47 [1] : vector<8x8xf32> to vector<8xf32>
    %128 = vector.shape_cast %127 : vector<8xf32> to vector<8x1xf32>
    %129 = vector.broadcast %128 : vector<8x1xf32> to vector<8x8xf32>
    %130 = arith.divf %126, %129 : vector<8x8xf32>
    %cst_48 = arith.constant dense<0xFF800000> : vector<8xf32>
    %131 = vector.multi_reduction <maximumf>, %106, %cst_48 [1] : vector<8x8xf32> to vector<8xf32>
    %132 = vector.shape_cast %131 : vector<8xf32> to vector<8x1xf32>
    %133 = vector.broadcast %132 : vector<8x1xf32> to vector<8x8xf32>
    %134 = arith.subf %106, %133 : vector<8x8xf32>
    %135 = math.exp %134 : vector<8x8xf32>
    %cst_49 = arith.constant dense<0.000000e+00> : vector<8xf32>
    %136 = vector.multi_reduction <add>, %135, %cst_49 [1] : vector<8x8xf32> to vector<8xf32>
    %137 = vector.shape_cast %136 : vector<8xf32> to vector<8x1xf32>
    %138 = vector.broadcast %137 : vector<8x1xf32> to vector<8x8xf32>
    %139 = arith.divf %135, %138 : vector<8x8xf32>
    %cst_50 = arith.constant dense<0xFF800000> : vector<8xf32>
    %140 = vector.multi_reduction <maximumf>, %112, %cst_50 [1] : vector<8x8xf32> to vector<8xf32>
    %141 = vector.shape_cast %140 : vector<8xf32> to vector<8x1xf32>
    %142 = vector.broadcast %141 : vector<8x1xf32> to vector<8x8xf32>
    %143 = arith.subf %112, %142 : vector<8x8xf32>
    %144 = math.exp %143 : vector<8x8xf32>
    %cst_51 = arith.constant dense<0.000000e+00> : vector<8xf32>
    %145 = vector.multi_reduction <add>, %144, %cst_51 [1] : vector<8x8xf32> to vector<8xf32>
    %146 = vector.shape_cast %145 : vector<8xf32> to vector<8x1xf32>
    %147 = vector.broadcast %146 : vector<8x1xf32> to vector<8x8xf32>
    %148 = arith.divf %144, %147 : vector<8x8xf32>
    %149 = vector.extract_strided_slice %87 {offsets = [0, 0], sizes = [8, 8], strides = [1, 1]} : vector<8x32xf32> to vector<8x8xf32>
    %cst_52 = arith.constant dense<0.000000e+00> : vector<8x8xf32>
    %150 = tpu.matmul %121, %149, %cst_52 {dimension_numbers = #tpu.dot_dimension_numbers<[1], [0], [0], [1], [0, 0, 1, 1], [], []>} : vector<8x8xf32>, vector<8x8xf32>, vector<8x8xf32> -> vector<8x8xf32>
    %151 = vector.extract_strided_slice %87 {offsets = [0, 8], sizes = [8, 8], strides = [1, 1]} : vector<8x32xf32> to vector<8x8xf32>
    %cst_53 = arith.constant dense<0.000000e+00> : vector<8x8xf32>
    %152 = tpu.matmul %130, %151, %cst_53 {dimension_numbers = #tpu.dot_dimension_numbers<[1], [0], [0], [1], [0, 0, 1, 1], [], []>} : vector<8x8xf32>, vector<8x8xf32>, vector<8x8xf32> -> vector<8x8xf32>
    %153 = vector.extract_strided_slice %87 {offsets = [0, 16], sizes = [8, 8], strides = [1, 1]} : vector<8x32xf32> to vector<8x8xf32>
    %cst_54 = arith.constant dense<0.000000e+00> : vector<8x8xf32>
    %154 = tpu.matmul %139, %153, %cst_54 {dimension_numbers = #tpu.dot_dimension_numbers<[1], [0], [0], [1], [0, 0, 1, 1], [], []>} : vector<8x8xf32>, vector<8x8xf32>, vector<8x8xf32> -> vector<8x8xf32>
    %155 = vector.extract_strided_slice %87 {offsets = [0, 24], sizes = [8, 8], strides = [1, 1]} : vector<8x32xf32> to vector<8x8xf32>
    %cst_55 = arith.constant dense<0.000000e+00> : vector<8x8xf32>
    %156 = tpu.matmul %148, %155, %cst_55 {dimension_numbers = #tpu.dot_dimension_numbers<[1], [0], [0], [1], [0, 0, 1, 1], [], []>} : vector<8x8xf32>, vector<8x8xf32>, vector<8x8xf32> -> vector<8x8xf32>
    %157 = tpu.concatenate %150, %152, %154, %156 in 1 : vector<8x8xf32>, vector<8x8xf32>, vector<8x8xf32>, vector<8x8xf32> -> vector<8x32xf32>
    %158 = tpu.concatenate %121, %130, %139, %148 in 1 : vector<8x8xf32>, vector<8x8xf32>, vector<8x8xf32>, vector<8x8xf32> -> vector<8x32xf32>
    %159 = tpu.concatenate %85, %157 in 0 : vector<8x32xf32>, vector<8x32xf32> -> vector<16x32xf32>
    %c0_56 = arith.constant 0 : index
    %c0_57 = arith.constant 0 : index
    %160 = vector.load %arg4[%c0_56, %c0_57] : memref<32x32xf32, #tpu.memory_space<vmem>>, vector<32x32xf32>
    %cst_58 = arith.constant dense<0.000000e+00> : vector<16x32xf32>
    %161 = tpu.matmul %159, %160, %cst_58 {dimension_numbers = #tpu.dot_dimension_numbers<[1], [0], [0], [1], [0, 0, 1, 1], [], []>} : vector<16x32xf32>, vector<32x32xf32>, vector<16x32xf32> -> vector<16x32xf32>
    %162 = vector.broadcast %6 : vector<1x32xf32> to vector<16x32xf32>
    %163 = arith.addf %161, %162 : vector<16x32xf32>
    %164 = arith.addf %163, %0 : vector<16x32xf32>
    %cst_59 = arith.constant dense<0.000000e+00> : vector<16xf32>
    %165 = vector.multi_reduction <add>, %164, %cst_59 [1] : vector<16x32xf32> to vector<16xf32>
    %166 = vector.shape_cast %165 : vector<16xf32> to vector<16x1xf32>
    %cst_60 = arith.constant 3.200000e+01 : f32
    %167 = vector.broadcast %cst_60 : f32 to vector<16x1xf32>
    %168 = arith.divf %166, %167 : vector<16x1xf32>
    %169 = vector.broadcast %168 : vector<16x1xf32> to vector<16x32xf32>
    %170 = arith.subf %164, %169 : vector<16x32xf32>
    %171 = arith.mulf %170, %170 : vector<16x32xf32>
    %cst_61 = arith.constant dense<0.000000e+00> : vector<16xf32>
    %172 = vector.multi_reduction <add>, %171, %cst_61 [1] : vector<16x32xf32> to vector<16xf32>
    %173 = vector.shape_cast %172 : vector<16xf32> to vector<16x1xf32>
    %cst_62 = arith.constant 3.200000e+01 : f32
    %174 = vector.broadcast %cst_62 : f32 to vector<16x1xf32>
    %175 = arith.divf %173, %174 : vector<16x1xf32>
    %176 = vector.broadcast %168 : vector<16x1xf32> to vector<16x32xf32>
    %177 = arith.subf %164, %176 : vector<16x32xf32>
    %cst_63 = arith.constant 9.99999974E-6 : f32
    %178 = vector.broadcast %cst_63 : f32 to vector<16x1xf32>
    %179 = arith.addf %175, %178 : vector<16x1xf32>
    %180 = math.rsqrt %179 : vector<16x1xf32>
    %181 = vector.broadcast %180 : vector<16x1xf32> to vector<16x32xf32>
    %182 = arith.mulf %177, %181 : vector<16x32xf32>
    %183 = vector.broadcast %7 : vector<1x32xf32> to vector<16x32xf32>
    %184 = arith.mulf %182, %183 : vector<16x32xf32>
    %185 = vector.broadcast %8 : vector<1x32xf32> to vector<16x32xf32>
    %186 = arith.addf %184, %185 : vector<16x32xf32>
    %c0_64 = arith.constant 0 : index
    %c0_65 = arith.constant 0 : index
    %187 = vector.load %arg5[%c0_64, %c0_65] : memref<32x128xf32, #tpu.memory_space<vmem>>, vector<32x128xf32>
    %cst_66 = arith.constant dense<0.000000e+00> : vector<16x128xf32>
    %188 = tpu.matmul %186, %187, %cst_66 {dimension_numbers = #tpu.dot_dimension_numbers<[1], [0], [0], [1], [0, 0, 1, 1], [], []>} : vector<16x32xf32>, vector<32x128xf32>, vector<16x128xf32> -> vector<16x128xf32>
    %189 = vector.broadcast %9 : vector<1x128xf32> to vector<16x128xf32>
    %190 = arith.addf %188, %189 : vector<16x128xf32>
    %cst_67 = arith.constant 5.000000e-01 : f32
    %191 = vector.broadcast %cst_67 : f32 to vector<16x128xf32>
    %192 = arith.mulf %190, %191 : vector<16x128xf32>
    %cst_68 = arith.constant 0.707106769 : f32
    %193 = vector.broadcast %cst_68 : f32 to vector<16x128xf32>
    %194 = arith.mulf %190, %193 : vector<16x128xf32>
    %195 = math.erf %194 : vector<16x128xf32>
    %cst_69 = arith.constant 1.000000e+00 : f32
    %196 = vector.broadcast %cst_69 : f32 to vector<16x128xf32>
    %197 = arith.addf %196, %195 : vector<16x128xf32>
    %198 = arith.mulf %192, %197 : vector<16x128xf32>
    %c0_70 = arith.constant 0 : index
    %c0_71 = arith.constant 0 : index
    %199 = vector.load %arg6[%c0_70, %c0_71] : memref<128x32xf32, #tpu.memory_space<vmem>>, vector<128x32xf32>
    %cst_72 = arith.constant dense<0.000000e+00> : vector<16x32xf32>
    %200 = tpu.matmul %198, %199, %cst_72 {dimension_numbers = #tpu.dot_dimension_numbers<[1], [0], [0], [1], [0, 0, 1, 1], [], []>} : vector<16x128xf32>, vector<128x32xf32>, vector<16x32xf32> -> vector<16x32xf32>
    %201 = vector.broadcast %10 : vector<1x32xf32> to vector<16x32xf32>
    %202 = arith.addf %200, %201 : vector<16x32xf32>
    %c0_73 = arith.constant 0 : index
    %c0_74 = arith.constant 0 : index
    %203 = vector.load %arg8[%c0_73, %c0_74] : memref<16x32xf32, #tpu.memory_space<vmem>>, vector<16x32xf32>
    tpu.vector_store %arg8[%c0_73, %c0_74], %202 {strides = array<i32>} : memref<16x32xf32, #tpu.memory_space<vmem>>, vector<16x32xf32>,
    %204 = tpu.concatenate %86, %158 in 0 : vector<8x32xf32>, vector<8x32xf32> -> vector<16x32xf32>
    %c0_75 = arith.constant 0 : index
    %c0_76 = arith.constant 0 : index
    %205 = vector.load %arg9[%c0_75, %c0_76] : memref<16x32xf32, #tpu.memory_space<vmem>>, vector<16x32xf32>
    tpu.vector_store %arg9[%c0_75, %c0_76], %204 {strides = array<i32>} : memref<16x32xf32, #tpu.memory_space<vmem>>, vector<16x32xf32>,
    return
  }
  func.func @transform_0(%arg0: i32) -> (i32, i32) {
    %c0_i32 = arith.constant 0 : i32
    %c0_i32_0 = arith.constant 0 : i32
    %c0_i32_1 = arith.constant 0 : i32
    return %c0_i32, %c0_i32_0 : i32, i32
  }
  func.func @transform_1(%arg0: i32) -> (i32, i32) {
    %c0_i32 = arith.constant 0 : i32
    %c0_i32_0 = arith.constant 0 : i32
    %c0_i32_1 = arith.constant 0 : i32
    return %c0_i32, %c0_i32_0 : i32, i32
  }
  func.func @transform_2(%arg0: i32) -> (i32, i32) {
    %c0_i32 = arith.constant 0 : i32
    %c0_i32_0 = arith.constant 0 : i32
    %c0_i32_1 = arith.constant 0 : i32
    return %c0_i32, %c0_i32_0 : i32, i32
  }
  func.func @transform_3(%arg0: i32) -> (i32, i32) {
    %c0_i32 = arith.constant 0 : i32
    %c0_i32_0 = arith.constant 0 : i32
    %c0_i32_1 = arith.constant 0 : i32
    return %c0_i32, %c0_i32_0 : i32, i32
  }
  func.func @transform_4(%arg0: i32) -> (i32, i32) {
    %c0_i32 = arith.constant 0 : i32
    %c0_i32_0 = arith.constant 0 : i32
    %c0_i32_1 = arith.constant 0 : i32
    return %c0_i32, %c0_i32_0 : i32, i32
  }
  func.func @transform_5(%arg0: i32) -> (i32, i32) {
    %c0_i32 = arith.constant 0 : i32
    %c0_i32_0 = arith.constant 0 : i32
    %c0_i32_1 = arith.constant 0 : i32
    return %c0_i32, %c0_i32_0 : i32, i32
  }
  func.func @transform_6(%arg0: i32) -> (i32, i32) {
    %c0_i32 = arith.constant 0 : i32
    %c0_i32_0 = arith.constant 0 : i32
    %c0_i32_1 = arith.constant 0 : i32
    return %c0_i32, %c0_i32_0 : i32, i32
  }
  func.func @transform_7(%arg0: i32) -> (i32, i32) {
    %c0_i32 = arith.constant 0 : i32
    %c0_i32_0 = arith.constant 0 : i32
    %c0_i32_1 = arith.constant 0 : i32
    return %c0_i32, %c0_i32_0 : i32, i32
  }
  func.func @transform_8(%arg0: i32) -> (i32, i32) {
    %c0_i32 = arith.constant 0 : i32
    %c0_i32_0 = arith.constant 0 : i32
    %c0_i32_1 = arith.constant 0 : i32
    return %c0_i32, %c0_i32_0 : i32, i32
  }
}

</mosaic_0001>

<bundles_post_ra>
// kernel: transformer_forward.1
= control target key start
LH: loop header
LB: loop body
LE: loop exit
PB: predicated region body
PF: predicated region fallthrough
CT: control target
= control target key end

     0   :  { %vm44_vm0 = vcmask 261120   ;;  %s2592_s0 = inlined_call_operand.vmem [shape: f32[16,32], index: 0, kind: input, shape index: {}]   ;;  %s2593_s1 = inlined_call_operand.vmem [shape: f32[16,8], index: 1, kind: input, shape index: {}]   ;;  %s2594_s2 = inlined_call_operand.vmem [shape: f32[32,32], index: 2, kind: input, shape index: {}]   ;;  %s2595_s3 = inlined_call_operand.vmem [shape: f32[32,32], index: 3, kind: input, shape index: {}]   ;;  %s2596_s4 = inlined_call_operand.vmem [shape: f32[32,128], index: 4, kind: input, shape index: {}]   ;;  %s2597_s5 = inlined_call_operand.vmem [shape: f32[128,32], index: 5, kind: input, shape index: {}]   ;;  %s2598_s6 = inlined_call_operand.vmem [shape: f32[8,128], index: 6, kind: input, shape index: {}]   ;;  %s2599_s7 = inlined_call_operand.hbm [shape: f32[16,32], index: 7, kind: output, shape index: {0}]   ;;  %s2600_s8 = inlined_call_operand.vmem [shape: f32[16,32], index: 8, kind: output, shape index: {1}]  }
   0x1   :  { %v36_v0 = vld [vmem:[%s2594_s2] sm:$0xff]  ;;  %v37_v1 = vld [vmem:[%s2594_s2 + $0x8] sm:$0xff]  ;;  %v38_v2 = vld [vmem:[%s2594_s2 + $0x10] sm:$0xff] }
   0x2   :  { %v2061_v3 = vpack.c.bf16 %v37_v1, %v36_v0  ;;  %v39_v4 = vld [vmem:[%s2594_s2 + $0x18] sm:$0xff]  ;;  %v2261_v5 = vld [vmem:[%s2592_s0] sm:$0xff] }
   0x3   :  { %v2065_v6 = vpack.c.bf16 %v39_v4, %v38_v2  ;;  %1921 = vmatprep.mubr.msk.f32.mxu1 %vm44_vm0, %v2261_v5 }
   0x4   :  { %14 = vsyncpa [#allocation3], 0  ;;  %2062 = vmatprep.subr.bf16.mxu1 %v2061_v3  ;;  %v2268_v7 = vld [vmem:[%s2592_s0 + $0x8] sm:$0xff]  ;;  %v2191_v8 = vmov 0.0   ;;  %vm2192_vm1 = vmmov 0   ;;  %v40_v9 = vlaneseq  ;;  %v2284_v12 = vld [vmem:[%s2598_s6] sm:$0xff] }
   0x5   :  { %2064 = vmatpush3.bf16.msra.mxu1 %v2061_v3  ;;  %1934 = vmatprep.subr.mxu0 %v2191_v8  ;;  %vm126_vm2 = vcmask 64512   ;;  %s2193_s17 = smov 104   ;;  %s2194_s18 = smov 120   ;;  %v31_v21 = vld [vmem:[%s2593_s1] sm:$0xff]  ;;  %vm782_vm5 = vcmask 130048   ;;  %vm784_vm6 = vcmask 195584  }
   0x6   :  { %2066 = vmatprep.subr.bf16.mxu1 %v2065_v6  ;;  %1936 = vmatprep.mubr.msk.f32.mxu0 %vm2192_vm1, %v2191_v8  ;;  %v2278_v10 = vshrl.u32 %v40_v9, 7  ;;  %s2195_s6 = smov 112   ;;  %vm33_vm3 = vcmp.ne.f32.partialorder %v31_v21, 0.0  ;;  %s2197_s23 = smov 24  }
   0x7   :  { %s2198_s24 = smov 16  }
   0x8   :  { %v42_v11 = vsub.s32 0, %v2278_v10 }
   0x9   :  { %2068 = vmatpush3.bf16.msra.mxu1 %v2065_v6 }
   0xa   :  { %1924 = vmatprep.subr.mxu1 %v2191_v8  ;;  %v43_v13 = vrot.slane %v2284_v12, %v42_v11 }
   0xc   :  { %1922 = vmatmul.mubr.msk.f32.vlgmr.msra.gmra.mrb[0].mxu1 %vm44_vm0, %v2268_v7 }
   0xd   :  { %1926 = vmatprep.mubr.msk.f32.mxu1 %vm2192_vm1, %v2191_v8 }
  0xdf   :  { %v1923_v14 = vpop.f32.mrb[0].mxu1 }
  0xe0   :  { %v2287_v15 = vadd.f32 %v1923_v14, %v43_v13  ;;  %v117_v16 = vpop.f32.mrb[1].mxu1 }
  0xe1   :  { %v118_v17 = vadd.f32 %v117_v16, %v43_v13 }
  0xe3   :  { %354 = vrot.lane.b32.xlu1 %v118_v17, %s2193_s17  ;;  %202 = vrot.lane.b32.xlu0 %v118_v17, %s2194_s18 }
  0xe4   :  { %1925 = vmatpush3.xpose.msk.msra.mxu1 %vm126_vm2, %v118_v17 }
  0xe5   :  { %1929 = vmatprep.subr.mxu1 %v2191_v8 }
  0xe7   :  { %1927 = vmatmul.mubr.msk.f32.vlgmr.msra.gmra.mrb[2].mxu1 %vm126_vm2, %v118_v17  ;;  %278 = vrot.lane.b32.xlu0 %v118_v17, %s2195_s6 }
  0xe8   :  { %1931 = vmatprep.mubr.msk.f32.mxu1 %vm2192_vm1, %v2191_v8 }
 0x155   :  { %v203_v18 = vpop.permute.xlu0 %202  ;;  %v2299_v19 = vpop.permute.xlu1 %354 }
 0x156   :  { %1930 = vmatpush3.xpose.msk.msra.mxu1 %vm126_vm2, %v203_v18 }
 0x157   :  { %1939 = vmatprep.subr.mxu1 %v2191_v8 }
 0x159   :  { %v2301_v20 = vpop.permute.xlu0 %278  ;;  %1932 = vmatmul.mubr.msk.f32.vlgmr.msra.gmra.mrb[4].mxu1 %vm126_vm2, %v203_v18 }
 0x15a   :  { %1935 = vmatpush3.xpose.msk.msra.mxu0 %vm126_vm2, %v2301_v20  ;;  %1940 = vmatpush3.xpose.msk.msra.mxu1 %vm126_vm2, %v2299_v19 }
 0x15b   :  { %1941 = vmatprep.mubr.msk.f32.mxu1 %vm2192_vm1, %v2191_v8  ;;  %1944 = vmatprep.subr.mxu0 %v2191_v8 }
 0x15c   :  { %1949 = vmatprep.subr.mxu1 %v2191_v8 }
 0x15d   :  { %1937 = vmatmul.mubr.msk.f32.vlgmr.msra.gmra.mrb[0].mxu0 %vm126_vm2, %v2301_v20  ;;  %1942 = vmatmul.mubr.msk.f32.vlgmr.msra.gmra.mrb[6].mxu1 %vm126_vm2, %v2299_v19 }
 0x15e   :  { %1945 = vmatpush3.msra.mxu0 %v118_v17  ;;  %1950 = vmatpush3.msra.mxu1 %v203_v18 }
 0x15f   :  { %1946 = vmatprep.mubr.msk.f32.mxu0 %vm2192_vm1, %v2191_v8  ;;  %1954 = vmatprep.subr.mxu0 %v2191_v8 }
 0x160   :  { %1951 = vmatprep.mubr.msk.f32.mxu1 %vm2192_vm1, %v2191_v8  ;;  %1959 = vmatprep.subr.mxu1 %v2191_v8 }
 0x1ba   :  { %v196_v22 = vpop.f32.mrb[2].mxu1 }
 0x1bb   :  { %v200_v23 = vmul.f32 0.35355338, %v196_v22  ;;  %v1928_v24 = vpop.f32.mrb[3].mxu1 }
 0x1bc   :  { %v32_v24 = vld [vmem:[%s2593_s1 + $0x8] sm:$0xff]  ;;  %s2196_s1 = smov 8  }
 0x1bd   :  { %v201_v25 = vsel %vm33_vm3, -1e+09, %v200_v23  ;;  %vm34_vm4 = vcmp.ne.f32.partialorder %v32_v24, 0.0 }
 0x1be   :  { %v430_v26 = vsel %vm126_vm2, %v201_v25, -inf }
 0x1bf   :  { %431 = vmax.xlane.f32.xlu1 %v430_v26 }
 0x22c   :  { %v272_v27 = vpop.f32.mrb[4].mxu1 }
 0x22d   :  { %v276_v28 = vmul.f32 0.35355338, %v272_v27  ;;  %v1933_v29 = vpop.f32.mrb[5].mxu1 }
 0x22f   :  { %v277_v30 = vsel %vm33_vm3, -1e+09, %v276_v28 }
 0x230   :  { %v348_v31 = vpop.f32.mrb[0].mxu0  ;;  %v424_v32 = vpop.f32.mrb[6].mxu1  ;;  %v441_v33 = vsel %vm126_vm2, %v277_v30, -inf }
 0x231   :  { %v352_v34 = vmul.f32 0.35355338, %v348_v31  ;;  %v428_v35 = vmul.f32 0.35355338, %v424_v32  ;;  %v1938_v36 = vpop.f32.mrb[1].mxu0  ;;  %442 = vmax.xlane.f32.xlu0 %v441_v33  ;;  %v1943_v37 = vpop.f32.mrb[7].mxu1 }
 0x233   :  { %v353_v38 = vsel %vm33_vm3, -1e+09, %v352_v34  ;;  %v429_v39 = vsel %vm33_vm3, -1e+09, %v428_v35 }
 0x234   :  { %v452_v40 = vsel %vm126_vm2, %v353_v38, -inf  ;;  %v463_v41 = vsel %vm126_vm2, %v429_v39, -inf }
 0x235   :  { %453 = vmax.xlane.f32.xlu0 %v452_v40  ;;  %464 = vmax.xlane.f32.xlu1 %v463_v41 }
 0x24c   :  { %v432_v42 = vpop.xlane.xlu1 %431 }
 0x24d   :  { %v433_v43 = vsub.f32 %v201_v25, %v432_v42 }
 0x24f   :  { %v434_v44 = vmul.f32 1.442695, %v433_v43 }
 0x251   :  { %2127 = vpow2.f32 %v434_v44 }
 0x25b   :  { %v2128_v45 = vpop.eup %2127 }
 0x25c   :  { %v436_v46 = vsel %vm126_vm2, %v2128_v45, 0.0 }
 0x25d   :  { %437 = vadd.xlane.f32.xlu0 %v436_v46 }
 0x2be   :  { %v443_v47 = vpop.xlane.xlu0 %442 }
 0x2bf   :  { %v444_v48 = vsub.f32 %v277_v30, %v443_v47 }
 0x2c1   :  { %v445_v49 = vmul.f32 1.442695, %v444_v48 }
 0x2c2   :  { %v454_v50 = vpop.xlane.xlu0 %453  ;;  %v465_v58 = vpop.xlane.xlu1 %464 }
 0x2c3   :  { %2129 = vpow2.f32 %v445_v49  ;;  %v455_v51 = vsub.f32 %v353_v38, %v454_v50  ;;  %v466_v59 = vsub.f32 %v429_v39, %v465_v58 }
 0x2c5   :  { %v456_v52 = vmul.f32 1.442695, %v455_v51  ;;  %v467_v60 = vmul.f32 1.442695, %v466_v59 }
 0x2c7   :  { %2131 = vpow2.f32 %v456_v52 }
 0x2cd   :  { %v2130_v53 = vpop.eup %2129 }
 0x2ce   :  { %v447_v54 = vsel %vm126_vm2, %v2130_v53, 0.0 }
 0x2cf   :  { %448 = vadd.xlane.f32.xlu1 %v447_v54 }
 0x2d1   :  { %v2132_v55 = vpop.eup %2131 }
 0x2d2   :  { %v458_v56 = vsel %vm126_vm2, %v2132_v55, 0.0 }
 0x2d3   :  { %459 = vadd.xlane.f32.xlu0 %v458_v56 }
 0x2e0   :  { %949 = vrot.lane.b32.xlu1 %v2287_v15, %s2195_s6 }
 0x2e9   :  { %873 = vrot.lane.b32.xlu0 %v2287_v15, %s2194_s18 }
 0x2ea   :  { %v438_v57 = vpop.xlane.xlu0 %437 }
 0x2eb   :  { %2133 = vrcp.f32 %v438_v57 }
 0x2ec   :  { %2135 = vpow2.f32 %v467_v60 }
 0x2f5   :  { %v2134_v61 = vpop.eup %2133 }
 0x2f6   :  { %v2340_v62 = vmul.f32 %v2134_v61, %v2128_v45  ;;  %v2136_v63 = vpop.eup %2135 }
 0x2f7   :  { %v469_v0 = vsel %vm126_vm2, %v2136_v63, 0.0 }
 0x2f8   :  { %1947 = vmatmul.mubr.msk.f32.vlgmr.msra.gmra.mrb[2].mxu0 %vm126_vm2, %v2340_v62 }
 0x2f9   :  { %1955 = vmatpush3.msra.mxu0 %v2301_v20  ;;  %1956 = vmatprep.mubr.msk.f32.mxu0 %vm2192_vm1, %v2191_v8 }
 0x2fa   :  { %1964 = vmatprep.subr.mxu0 %v2191_v8 }
 0x304   :  { %470 = vadd.xlane.f32.xlu1 %v469_v0 }
 0x315   :  { %1025 = vrot.lane.b32.xlu1 %v2287_v15, %s2193_s17 }
 0x35c   :  { %v449_v1 = vpop.xlane.xlu1 %448 }
 0x35d   :  { %2137 = vrcp.f32 %v449_v1 }
 0x360   :  { %v460_v2 = vpop.xlane.xlu0 %459  ;;  %v2368_v11 = vpop.permute.xlu1 %949 }
 0x361   :  { %2139 = vrcp.f32 %v460_v2 }
 0x364   :  { %v874_v17 = vpop.permute.xlu0 %873 }
 0x367   :  { %v2138_v3 = vpop.eup %2137 }
 0x368   :  { %v2351_v4 = vmul.f32 %v2138_v3, %v2130_v53 }
 0x36a   :  { %1952 = vmatmul.mubr.msk.f32.vlgmr.msra.gmra.mrb[8].mxu1 %vm126_vm2, %v2351_v4 }
 0x36b   :  { %v2140_v6 = vpop.eup %2139  ;;  %1960 = vmatpush3.msra.mxu1 %v2299_v19  ;;  %1961 = vmatprep.mubr.msk.f32.mxu1 %vm2192_vm1, %v2191_v8 }
 0x36c   :  { %v2358_v9 = vmul.f32 %v2140_v6, %v2132_v55  ;;  %1969 = vmatprep.subr.mxu1 %v2191_v8 }
 0x36e   :  { %1957 = vmatmul.mubr.msk.f32.vlgmr.msra.gmra.mrb[4].mxu0 %vm126_vm2, %v2358_v9 }
 0x36f   :  { %1965 = vmatpush3.xpose.msk.msra.mxu0 %vm126_vm2, %v2287_v15  ;;  %1966 = vmatprep.mubr.msk.f32.mxu0 %vm2192_vm1, %v2191_v8 }
 0x370   :  { %1974 = vmatprep.subr.mxu0 %v2191_v8 }
 0x372   :  { %1967 = vmatmul.mubr.msk.f32.vlgmr.msra.gmra.mrb[6].mxu0 %vm126_vm2, %v2287_v15 }
 0x373   :  { %1975 = vmatpush3.xpose.msk.msra.mxu0 %vm126_vm2, %v2368_v11  ;;  %1976 = vmatprep.mubr.msk.f32.mxu0 %vm2192_vm1, %v2191_v8 }
 0x374   :  { %1984 = vmatprep.subr.mxu0 %v2191_v8 }
 0x376   :  { %1977 = vmatmul.mubr.msk.f32.vlgmr.msra.gmra.mrb[8].mxu0 %vm126_vm2, %v2368_v11 }
 0x377   :  { %1985 = vmatpush3.msra.mxu0 %v2287_v15  ;;  %1986 = vmatprep.mubr.msk.f32.mxu0 %vm2192_vm1, %v2191_v8 }
 0x378   :  { %1994 = vmatprep.subr.mxu0 %v2191_v8 }
 0x391   :  { %v471_v13 = vpop.xlane.xlu1 %470 }
 0x392   :  { %2141 = vrcp.f32 %v471_v13 }
 0x395   :  { %v2391_v15 = vpop.permute.xlu1 %1025 }
 0x39c   :  { %v2142_v14 = vpop.eup %2141 }
 0x39d   :  { %v2383_v16 = vmul.f32 %v2142_v14, %v2136_v63 }
 0x39f   :  { %1962 = vmatmul.mubr.msk.f32.vlgmr.msra.gmra.mrb[10].mxu1 %vm126_vm2, %v2383_v16 }
 0x3a0   :  { %1970 = vmatpush3.xpose.msk.msra.mxu1 %vm126_vm2, %v874_v17  ;;  %1971 = vmatprep.mubr.msk.f32.mxu1 %vm2192_vm1, %v2191_v8 }
 0x3a1   :  { %1979 = vmatprep.subr.mxu1 %v2191_v8 }
 0x3a3   :  { %1972 = vmatmul.mubr.msk.f32.vlgmr.msra.gmra.mrb[12].mxu1 %vm126_vm2, %v874_v17 }
 0x3a4   :  { %1980 = vmatpush3.xpose.msk.msra.mxu1 %vm126_vm2, %v2391_v15  ;;  %1981 = vmatprep.mubr.msk.f32.mxu1 %vm2192_vm1, %v2191_v8 }
 0x3a5   :  { %1989 = vmatprep.subr.mxu1 %v2191_v8 }
 0x3a7   :  { %1982 = vmatmul.mubr.msk.f32.vlgmr.msra.gmra.mrb[14].mxu1 %vm126_vm2, %v2391_v15 }
 0x3a8   :  { %1990 = vmatpush3.msra.mxu1 %v874_v17  ;;  %1991 = vmatprep.mubr.msk.f32.mxu1 %vm2192_vm1, %v2191_v8 }
 0x3a9   :  { %1999 = vmatprep.subr.mxu1 %v2191_v8 }
 0x3cb   :  { %v2404_v18 = vpop.f32.mrb[2].mxu0 }
 0x3cc   :  { %v1948_v19 = vpop.f32.mrb[3].mxu0 }
 0x43d   :  { %v617_v20 = vpop.f32.mrb[8].mxu1 }
 0x43e   :  { %v1953_v21 = vpop.f32.mrb[9].mxu1 }
 0x441   :  { %v691_v22 = vpop.f32.mrb[4].mxu0 }
 0x442   :  { %v1958_v23 = vpop.f32.mrb[5].mxu0 }
 0x445   :  { %v867_v25 = vpop.f32.mrb[6].mxu0 }
 0x446   :  { %v871_v26 = vmul.f32 0.35355338, %v867_v25  ;;  %v1968_v27 = vpop.f32.mrb[7].mxu0 }
 0x448   :  { %v872_v28 = vsel %vm34_vm4, -1e+09, %v871_v26 }
 0x449   :  { %v1019_v29 = vpop.f32.mrb[8].mxu0  ;;  %v1101_v30 = vsel %vm126_vm2, %v872_v28, -inf }
 0x44a   :  { %v1023_v31 = vmul.f32 0.35355338, %v1019_v29  ;;  %1102 = vmax.xlane.f32.xlu0 %v1101_v30  ;;  %v1978_v32 = vpop.f32.mrb[9].mxu0 }
 0x44c   :  { %v1024_v33 = vsel %vm34_vm4, -1e+09, %v1023_v31 }
 0x44d   :  { %v1123_v34 = vsel %vm126_vm2, %v1024_v33, -inf }
 0x44e   :  { %1124 = vmax.xlane.f32.xlu0 %v1123_v34 }
 0x472   :  { %v765_v35 = vpop.f32.mrb[10].mxu1 }
 0x473   :  { %v1963_v36 = vpop.f32.mrb[11].mxu1 }
 0x474   :  { %v1469_v36 = vld [vmem:[%s2595_s3 + $0x10] sm:$0xff] }
 0x476   :  { %v943_v37 = vpop.f32.mrb[12].mxu1 }
 0x477   :  { %v947_v38 = vmul.f32 0.35355338, %v943_v37  ;;  %v1973_v39 = vpop.f32.mrb[13].mxu1  ;;  %v1470_v37 = vld [vmem:[%s2595_s3 + $0x18] sm:$0xff] }
 0x479   :  { %v948_v40 = vsel %vm34_vm4, -1e+09, %v947_v38  ;;  %v2073_v38 = vpack.c.bf16 %v1470_v37, %v1469_v36  ;;  %v1587_v37 = vsub.s32 2, %v2278_v10 }
 0x47a   :  { %v1095_v41 = vpop.f32.mrb[14].mxu1  ;;  %v1112_v42 = vsel %vm126_vm2, %v948_v40, -inf }
 0x47b   :  { %v1099_v43 = vmul.f32 0.35355338, %v1095_v41  ;;  %1113 = vmax.xlane.f32.xlu1 %v1112_v42  ;;  %v1983_v44 = vpop.f32.mrb[15].mxu1 }
 0x47d   :  { %v1100_v45 = vsel %vm34_vm4, -1e+09, %v1099_v43 }
 0x47e   :  { %v1134_v46 = vsel %vm126_vm2, %v1100_v45, -inf }
 0x47f   :  { %1135 = vmax.xlane.f32.xlu0 %v1134_v46 }
 0x4d7   :  { %v1103_v47 = vpop.xlane.xlu0 %1102 }
 0x4d8   :  { %v1104_v48 = vsub.f32 %v872_v28, %v1103_v47 }
 0x4da   :  { %v1105_v49 = vmul.f32 1.442695, %v1104_v48 }
 0x4db   :  { %v1125_v50 = vpop.xlane.xlu0 %1124 }
 0x4dc   :  { %2143 = vpow2.f32 %v1105_v49  ;;  %v1126_v51 = vsub.f32 %v1024_v33, %v1125_v50  ;;  %v1473_v49 = vsub.s32 1, %v2278_v10 }
 0x4de   :  { %v1127_v52 = vmul.f32 1.442695, %v1126_v51  ;;  %v1474_v50 = vrot.slane %v2284_v12, %v1473_v49 }
 0x4e0   :  { %2145 = vpow2.f32 %v1127_v52 }
 0x4e6   :  { %v2144_v53 = vpop.eup %2143 }
 0x4e7   :  { %v1107_v54 = vsel %vm126_vm2, %v2144_v53, 0.0 }
 0x4e8   :  { %1108 = vadd.xlane.f32.xlu1 %v1107_v54 }
 0x4ea   :  { %v2146_v55 = vpop.eup %2145 }
 0x4eb   :  { %v1129_v56 = vsel %vm126_vm2, %v2146_v55, 0.0 }
 0x4ec   :  { %1130 = vadd.xlane.f32.xlu1 %v1129_v56 }
 0x4fd   :  { %770 = vrot.lane.b32.xlu1 %v617_v20, %s2196_s1 }
 0x501   :  { %778 = vrot.lane.b32.xlu1 %v765_v35, %s2197_s23 }
 0x508   :  { %v1114_v57 = vpop.xlane.xlu1 %1113 }
 0x509   :  { %v1115_v58 = vsub.f32 %v948_v40, %v1114_v57 }
 0x50b   :  { %v1116_v59 = vmul.f32 1.442695, %v1115_v58 }
 0x50c   :  { %v1136_v60 = vpop.xlane.xlu0 %1135 }
 0x50d   :  { %2147 = vpow2.f32 %v1116_v59  ;;  %v1137_v61 = vsub.f32 %v1100_v45, %v1136_v60 }
 0x50f   :  { %v1138_v63 = vmul.f32 1.442695, %v1137_v61 }
 0x511   :  { %2149 = vpow2.f32 %v1138_v63 }
 0x517   :  { %v2148_v0 = vpop.eup %2147 }
 0x518   :  { %v1118_v1 = vsel %vm126_vm2, %v2148_v0, 0.0 }
 0x519   :  { %1119 = vadd.xlane.f32.xlu0 %v1118_v1 }
 0x51b   :  { %v2150_v2 = vpop.eup %2149 }
 0x51c   :  { %v1140_v3 = vsel %vm126_vm2, %v2150_v2, 0.0 }
 0x51d   :  { %1141 = vadd.xlane.f32.xlu0 %v1140_v3  ;;  %v1598_v3 = vld [vmem:[%s2596_s4 + $0x8] sm:$0xff] }
 0x533   :  { %774 = vrot.lane.b32.xlu0 %v691_v22, %s2198_s24 }
 0x575   :  { %v1109_v6 = vpop.xlane.xlu1 %1108 }
 0x576   :  { %2151 = vrcp.f32 %v1109_v6 }
 0x579   :  { %v1131_v13 = vpop.xlane.xlu1 %1130 }
 0x57a   :  { %2153 = vrcp.f32 %v1131_v13  ;;  %v1599_v13 = vld [vmem:[%s2596_s4 + $0x10] sm:$0xff] }
 0x57d   :  { %v771_v24 = vpop.permute.xlu1 %770 }
 0x580   :  { %v2152_v14 = vpop.eup %2151 }
 0x581   :  { %v2424_v17 = vmul.f32 %v2152_v14, %v2144_v53  ;;  %v779_v30 = vpop.permute.xlu1 %778  ;;  %v1600_v14 = vld [vmem:[%s2596_s4 + $0x18] sm:$0xff] }
 0x583   :  { %1987 = vmatmul.mubr.msk.f32.vlgmr.msra.gmra.mrb[10].mxu0 %vm126_vm2, %v2424_v17 }
 0x584   :  { %v2154_v19 = vpop.eup %2153  ;;  %1995 = vmatpush3.msra.mxu0 %v2368_v11  ;;  %1996 = vmatprep.mubr.msk.f32.mxu0 %vm2192_vm1, %v2191_v8  ;;  %v781_v11 = vsel %vm126_vm2, %v2404_v18, %v771_v24  ;;  %v1467_v18 = vld [vmem:[%s2595_s3] sm:$0xff] }
 0x585   :  { %v2431_v20 = vmul.f32 %v2154_v19, %v2146_v55  ;;  %v1696_v19 = vld [vmem:[%s2597_s5] sm:$0xff] }
 0x587   :  { %1997 = vmatmul.mubr.msk.f32.vlgmr.msra.gmra.mrb[12].mxu0 %vm126_vm2, %v2431_v20 }
 0x5a6   :  { %v1120_v21 = vpop.xlane.xlu0 %1119 }
 0x5a7   :  { %2155 = vrcp.f32 %v1120_v21  ;;  %v1698_v21 = vld [vmem:[%s2597_s5 + $0x10] sm:$0xff] }
 0x5aa   :  { %v1142_v22 = vpop.xlane.xlu0 %1141 }
 0x5ab   :  { %2157 = vrcp.f32 %v1142_v22 }
 0x5ae   :  { %v775_v26 = vpop.permute.xlu0 %774 }
 0x5af   :  { %v783_v28 = vsel %vm782_vm5, %v781_v11, %v775_v26  ;;  %v1701_v26 = vld [vmem:[%s2597_s5 + $0x28] sm:$0xff] }
 0x5b0   :  { %v785_v31 = vsel %vm784_vm6, %v783_v28, %v779_v30 }
 0x5b1   :  { %v2156_v23 = vpop.eup %2155 }
 0x5b2   :  { %v2435_v25 = vmul.f32 %v2156_v23, %v2148_v0  ;;  %v1699_v23 = vld [vmem:[%s2597_s5 + $0x18] sm:$0xff] }
 0x5b3   :  { %v2089_v24 = vpack.c.bf16 %v1699_v23, %v1698_v21 }
 0x5b4   :  { %1992 = vmatmul.mubr.msk.f32.vlgmr.msra.gmra.mrb[16].mxu1 %vm126_vm2, %v2435_v25 }
 0x5b5   :  { %v2158_v27 = vpop.eup %2157  ;;  %2000 = vmatpush3.msra.mxu1 %v2391_v15  ;;  %2001 = vmatprep.mubr.msk.f32.mxu1 %vm2192_vm1, %v2191_v8  ;;  %v1468_v15 = vld [vmem:[%s2595_s3 + $0x8] sm:$0xff] }
 0x5b6   :  { %v1144_v29 = vmul.f32 %v2158_v27, %v2150_v2  ;;  %v2069_v32 = vpack.c.bf16 %v1468_v15, %v1467_v18  ;;  %v1597_v2 = vld [vmem:[%s2596_s4] sm:$0xff] }
 0x5b7   :  { %v2077_v6 = vpack.c.bf16 %v1598_v3, %v1597_v2 }
 0x5b8   :  { %2002 = vmatmul.mubr.msk.f32.vlgmr.msra.gmra.mrb[18].mxu1 %vm126_vm2, %v1144_v29  ;;  %2070 = vmatprep.subr.bf16.mxu1 %v2069_v32 }
 0x5b9   :  { %2012 = vmatprep.mubr.msk.f32.mxu1 %vm44_vm0, %v785_v31  ;;  %2072 = vmatpush3.bf16.msra.mxu1 %v2069_v32 }
 0x5ba   :  { %2074 = vmatprep.subr.bf16.mxu1 %v2073_v38 }
 0x5bd   :  { %2076 = vmatpush3.bf16.msra.mxu1 %v2073_v38 }
 0x5be   :  { %2078 = vmatprep.subr.bf16.mxu1 %v2077_v6 }
 0x656   :  { %v1214_v8 = vpop.f32.mrb[10].mxu0 }
 0x657   :  { %v1988_v33 = vpop.f32.mrb[11].mxu0 }
 0x65a   :  { %v1362_v34 = vpop.f32.mrb[12].mxu0 }
 0x65b   :  { %v1998_v35 = vpop.f32.mrb[13].mxu0  ;;  %1445 = vrot.lane.b32.xlu0 %v1362_v34, %s2198_s24 }
 0x687   :  { %v1288_v39 = vpop.f32.mrb[16].mxu1 }
 0x688   :  { %1441 = vrot.lane.b32.xlu1 %v1288_v39, %s2196_s1  ;;  %v1993_v40 = vpop.f32.mrb[17].mxu1 }
 0x68b   :  { %v1436_v41 = vpop.f32.mrb[18].mxu1 }
 0x68c   :  { %1449 = vrot.lane.b32.xlu1 %v1436_v41, %s2197_s23  ;;  %v2003_v42 = vpop.f32.mrb[19].mxu1 }
 0x6cd   :  { %v1446_v45 = vpop.permute.xlu0 %1445 }
 0x6fa   :  { %v1442_v43 = vpop.permute.xlu1 %1441 }
 0x6fb   :  { %v1452_v44 = vsel %vm126_vm2, %v1214_v8, %v1442_v43 }
 0x6fc   :  { %v1453_v46 = vsel %vm782_vm5, %v1452_v44, %v1446_v45 }
 0x6fe   :  { %v1450_v47 = vpop.permute.xlu1 %1449 }
 0x6ff   :  { %v1454_v48 = vsel %vm784_vm6, %v1453_v46, %v1450_v47 }
 0x700   :  { %2013 = vmatmul.mubr.msk.f32.vlgmr.msra.gmra.mrb[20].mxu1 %vm44_vm0, %v1454_v48 }
 0x701   :  { %2080 = vmatpush3.bf16.msra.mxu1 %v2077_v6 }
 0x7d3   :  { %v2014_v51 = vpop.f32.mrb[20].mxu1 }
 0x7d4   :  { %v1553_v52 = vadd.f32 %v2014_v51, %v1474_v50  ;;  %v1547_v53 = vpop.f32.mrb[21].mxu1 }
 0x7d5   :  { %v1548_v54 = vadd.f32 %v1547_v53, %v1474_v50  ;;  %v1703_v53 = vld [vmem:[%s2597_s5 + $0x38] sm:$0xff] }
 0x7d6   :  { %v1557_v55 = vadd.f32 %v1553_v52, %v2268_v7  ;;  %v1702_v52 = vld [vmem:[%s2597_s5 + $0x30] sm:$0xff] }
 0x7d7   :  { %v1556_v56 = vadd.f32 %v1548_v54, %v2261_v5  ;;  %v2097_v54 = vpack.c.bf16 %v1703_v53, %v1702_v52 }
 0x7d8   :  { %v1561_v57 = vsel %vm44_vm0, %v1557_v55, 0.0 }
 0x7d9   :  { %1562 = vadd.xlane.f32.xlu1 %v1561_v57  ;;  %v1558_v58 = vsel %vm44_vm0, %v1556_v56, 0.0 }
 0x7da   :  { %1559 = vadd.xlane.f32.xlu0 %v1558_v58  ;;  %v1706_v58 = vld [vmem:[%s2597_s5 + $0x50] sm:$0xff] }
 0x7ea   :  { %786 = vrot.lane.b32.xlu1 %v2351_v4, %s2196_s1 }
 0x7ee   :  { %789 = vrot.lane.b32.xlu1 %v2358_v9, %s2198_s24 }
 0x7f2   :  { %1458 = vrot.lane.b32.xlu1 %v2431_v20, %s2198_s24  ;;  %v1697_v20 = vld [vmem:[%s2597_s5 + $0x8] sm:$0xff] }
 0x7f3   :  { %v2085_v22 = vpack.c.bf16 %v1697_v20, %v1696_v19 }
 0x7f5   :  { %2086 = vmatprep.subr.bf16.mxu0 %v2085_v22 }
 0x7f6   :  { %1461 = vrot.lane.b32.xlu1 %v1144_v29, %s2197_s23  ;;  %2088 = vmatpush3.bf16.msra.mxu0 %v2085_v22 }
 0x7f7   :  { %2090 = vmatprep.subr.bf16.mxu0 %v2089_v24 }
 0x7fa   :  { %2092 = vmatpush3.bf16.msra.mxu0 %v2089_v24 }
 0x866   :  { %v1563_v7 = vpop.xlane.xlu1 %1562 }
 0x867   :  { %v1566_v59 = vmul.f32 0.03125, %v1563_v7  ;;  %v1560_v5 = vpop.xlane.xlu0 %1559  ;;  %v1707_v7 = vld [vmem:[%s2597_s5 + $0x58] sm:$0xff] }
 0x868   :  { %v1565_v60 = vmul.f32 0.03125, %v1560_v5  ;;  %v1708_v5 = vld [vmem:[%s2597_s5 + $0x60] sm:$0xff] }
 0x869   :  { %v2480_v61 = vsub.f32 %v1557_v55, %v1566_v59  ;;  %v1704_v55 = vld [vmem:[%s2597_s5 + $0x40] sm:$0xff]  ;;  %v2105_v59 = vpack.c.bf16 %v1707_v7, %v1706_v58 }
 0x86a   :  { %v1567_v63 = vsub.f32 %v1556_v56, %v1565_v60  ;;  %v787_v27 = vpop.permute.xlu1 %786  ;;  %v1705_v56 = vld [vmem:[%s2597_s5 + $0x48] sm:$0xff] }
 0x86b   :  { %v1570_v4 = vmul.f32 %v2480_v61, %v2480_v61  ;;  %v795_v38 = vsel %vm126_vm2, %v2340_v62, %v787_v27  ;;  %v1588_v62 = vrot.slane %v2284_v12, %v1587_v37  ;;  %v2101_v57 = vpack.c.bf16 %v1705_v56, %v1704_v55  ;;  %v1709_v60 = vld [vmem:[%s2597_s5 + $0x68] sm:$0xff] }
 0x86c   :  { %v1569_v0 = vmul.f32 %v1567_v63, %v1567_v63 }
 0x86d   :  { %v1574_v9 = vsel %vm44_vm0, %v1570_v4, 0.0  ;;  %v1603_v4 = vsub.s32 4, %v2278_v10 }
 0x86e   :  { %v1571_v1 = vsel %vm44_vm0, %v1569_v0, 0.0  ;;  %v790_v28 = vpop.permute.xlu1 %789  ;;  %v1711_v0 = vld [vmem:[%s2597_s5 + $0x78] sm:$0xff] }
 0x86f   :  { %1572 = vadd.xlane.f32.xlu0 %v1571_v1  ;;  %v796_v40 = vsel %vm782_vm5, %v795_v38, %v790_v28 }
 0x872   :  { %v1459_v18 = vpop.permute.xlu1 %1458 }
 0x873   :  { %1575 = vadd.xlane.f32.xlu0 %v1574_v9  ;;  %v1604_v9 = vrot.slane %v2284_v12, %v1603_v4 }
 0x876   :  { %v1462_v35 = vpop.permute.xlu1 %1461 }
 0x889   :  { %1455 = vrot.lane.b32.xlu0 %v2435_v25, %s2196_s1  ;;  %v1700_v25 = vld [vmem:[%s2597_s5 + $0x20] sm:$0xff] }
 0x88a   :  { %v2093_v11 = vpack.c.bf16 %v1701_v26, %v1700_v25 }
 0x88c   :  { %2094 = vmatprep.subr.bf16.mxu0 %v2093_v11 }
 0x88d   :  { %792 = vrot.lane.b32.xlu0 %v2383_v16, %s2197_s23  ;;  %v2081_v16 = vpack.c.bf16 %v1600_v14, %v1599_v13  ;;  %2096 = vmatpush3.bf16.msra.mxu0 %v2093_v11  ;;  %v1714_v11 = vsub.s32 5, %v2278_v10 }
 0x88e   :  { %2098 = vmatprep.subr.bf16.mxu0 %v2097_v54 }
 0x88f   :  { %2082 = vmatprep.subr.bf16.mxu1 %v2081_v16  ;;  %v1715_v27 = vrot.slane %v2284_v12, %v1714_v11 }
 0x890   :  { %2084 = vmatpush3.bf16.msra.mxu1 %v2081_v16 }
 0x891   :  { %2100 = vmatpush3.bf16.msra.mxu0 %v2097_v54 }
 0x892   :  { %2102 = vmatprep.subr.bf16.mxu0 %v2101_v57 }
 0x895   :  { %2104 = vmatpush3.bf16.msra.mxu0 %v2101_v57 }
 0x896   :  { %2106 = vmatprep.subr.bf16.mxu0 %v2105_v59 }
 0x899   :  { %2108 = vmatpush3.bf16.msra.mxu0 %v2105_v59 }
 0x8fc   :  { %v1573_v29 = vpop.xlane.xlu0 %1572 }
 0x8fd   :  { %v1577_v30 = vmul.f32 0.03125, %v1573_v29 }
 0x8ff   :  { %v1579_v31 = vadd.f32 1e-05, %v1577_v30 }
 0x900   :  { %v1576_v15 = vpop.xlane.xlu0 %1575 }
 0x901   :  { %2159 = vrsqrt.f32 %v1579_v31  ;;  %v1578_v32 = vmul.f32 0.03125, %v1576_v15 }
 0x903   :  { %v1580_v8 = vadd.f32 1e-05, %v1578_v32 }
 0x904   :  { %v1456_v33 = vpop.permute.xlu0 %1455 }
 0x905   :  { %2161 = vrsqrt.f32 %v1580_v8  ;;  %v1464_v34 = vsel %vm126_vm2, %v2424_v17, %v1456_v33  ;;  %v1593_v17 = vsub.s32 3, %v2278_v10 }
 0x906   :  { %v1465_v36 = vsel %vm782_vm5, %v1464_v34, %v1459_v18 }
 0x907   :  { %v1466_v39 = vsel %vm784_vm6, %v1465_v36, %v1462_v35  ;;  %v1594_v45 = vrot.slane %v2284_v12, %v1593_v17 }
 0x908   :  { %1794 = vst.msk [vmem:[%s2600_s8 + $0x8] sm:$0xff] %vm44_vm0, %v1466_v39  ;;  %v793_v41 = vpop.permute.xlu0 %792 }
 0x909   :  { %v797_v42 = vsel %vm784_vm6, %v796_v40, %v793_v41 }
 0x90a   :  { %1793 = vst.msk [vmem:[%s2600_s8] sm:$0xff] %vm44_vm0, %v797_v42 }
 0x90b   :  { %v2160_v43 = vpop.eup %2159 }
 0x90c   :  { %v1583_v44 = vmul.f32 %v2160_v43, %v1567_v63  ;;  %v1710_v63 = vld [vmem:[%s2597_s5 + $0x70] sm:$0xff]  ;;  %s2199_s5 = smov [#allocation2]  }
 0x90d   :  { %v2113_v1 = vpack.c.bf16 %v1711_v0, %v1710_v63  ;;  %s1800_s4 = sshll.u32 %s2199_s5, 4  ;;  %s1801_s4 = int_to_ptr.vmem [resolvable:$true] %s1800_s4 }
 0x90e   :  { %v1589_v46 = vmul.f32 %v1588_v62, %v1583_v44  ;;  %s2167_s23 = scalar_lea.vmem %s1801_s4, 256  ;;  %p2172_p1 = scmp.lt.s32.totalorder %s1801_s4, %s1801_s4 }
 0x90f   :  { %v2162_v47 = vpop.eup %2161  ;;  %p2168_p0 = scmp.ne.s32.totalorder %s1801_s4, %s2167_s23  ;;  %p2173_p2 = scmp.lt.s32.totalorder %s2167_s23, %s2167_s23 }
 0x910   :  { %v1584_v48 = vmul.f32 %v2162_v47, %v2480_v61  ;;  %v1595_v49 = vadd.f32 %v1594_v45, %v1589_v46  ;;  %v2109_v61 = vpack.c.bf16 %v1709_v60, %v1708_v5 }
 0x911   :  { %p2174_p3 = por %p2173_p2, %p2172_p1 }
 0x912   :  { %v1590_v50 = vmul.f32 %v1588_v62, %v1584_v48  ;;  %2023 = vmatprep.mubr.msk.f32.mxu1 %vm44_vm0, %v1595_v49  ;;  %2110 = vmatprep.subr.bf16.mxu0 %v2109_v61 }
 0x913   :  { %2112 = vmatpush3.bf16.msra.mxu0 %v2109_v61  ;;  %p2175_p4 = pnand %p2174_p3, %p2168_p0 }
 0x914   :  { %v1596_v51 = vadd.f32 %v1594_v45, %v1590_v50  ;;  %2114 = vmatprep.subr.bf16.mxu0 %v2113_v1 }
 0x916   :  { %2024 = vmatmul.mubr.msk.f32.vlgmr.msra.gmra.mrb[22].mxu1 %vm44_vm0, %v1596_v51 }
 0x917   :  { %2116 = vmatpush3.bf16.msra.mxu0 %v2113_v1 }
 0x9e9   :  { %v2025_v2 = vpop.f32.mrb[22].mxu1 }
 0x9ea   :  { %v1683_v3 = vadd.f32 %v2025_v2, %v1604_v9  ;;  %v1677_v6 = vpop.f32.mrb[23].mxu1 }
 0x9eb   :  { %v1678_v13 = vadd.f32 %v1677_v6, %v1604_v9 }
 0x9ec   :  { %v1689_v14 = vmul.f32 0.70710677, %v1683_v3  ;;  %v1687_v24 = vmul.f32 0.5, %v1683_v3 }
 0x9ed   :  { %v1688_v16 = vmul.f32 0.70710677, %v1678_v13  ;;  %v1686_v22 = vmul.f32 0.5, %v1678_v13 }
 0x9ee   :  { %2163 = verf.f32 %v1689_v14 }
 0x9ef   :  { %2165 = verf.f32 %v1688_v16 }
 0x9f8   :  { %v2164_v19 = vpop.eup %2163 }
 0x9f9   :  { %v2166_v20 = vpop.eup %2165  ;;  %v1693_v21 = vadd.f32 1.0, %v2164_v19 }
 0x9fa   :  { %v1692_v23 = vadd.f32 1.0, %v2166_v20 }
 0x9fb   :  { %v1695_v26 = vmul.f32 %v1693_v21, %v1687_v24 }
 0x9fc   :  { %v1694_v25 = vmul.f32 %v1692_v23, %v1686_v22 }
 0x9fe   :  { %2058 = vmatprep.mubr.f32.mxu0 %v1694_v25 }
 0x9ff   :  { %2059 = vmatmul.mubr.f32.vlgmr.msra.gmra.mrb[14].mxu0 %v1695_v26 }
 0xad2   :  { %v2060_v28 = vpop.f32.mrb[14].mxu0 }
 0xad3   :  { %v1788_v29 = vadd.f32 %v2060_v28, %v1715_v27  ;;  %v1782_v30 = vpop.f32.mrb[15].mxu0 }
 0xad4   :  { %v1783_v31 = vadd.f32 %v1782_v30, %v1715_v27 }
 0xad5   :  { %1792 = vst.msk [vmem:[#allocation2 + $0x8] sm:$0xff] %vm44_vm0, %v1788_v29 }
 0xad6   :  { %1791 = vst.msk [vmem:[#allocation2] sm:$0xff] %vm44_vm0, %v1783_v31 }
 0xad7   :  { %2178 = shalt.err (!%p2175_p4)
}
 0xad8   :  { %s2179_s26 = scalar_lea.hbm %s2599_s7, 256 }
 0xad9   :  { %p2180_p5 = scmp.ne.s32.totalorder %s2599_s7, %s2179_s26  ;;  %p2183_p6 = scmp.lt.u32.totalorder %s2179_s26, %s2599_s7 }
 0xadb   :  { %p2185_p7 = pnand %p2183_p6, %p2180_p5 }
 0xadd   :  { %2188 = shalt.err (!%p2185_p7)
}
 0xade   :  { %s2200_s9 = smov 128  }
 0xadf   :  { %1806 = dma.vmem_to_hbm [thread:$0]  %s1801_s4, 256, %s2599_s7, [#allocation3], %s2200_s9, %s2200_s9, %s2196_s1  }
 0xae0   :  { %2189 = dma.done.wait [#allocation3], 256  }
 0xae1   :  { %2190 = vsyncadd [#allocation3], 4294967040 }
 0xae2   :  { %1814 = vsyncpa [#allocation3], 1 }

</bundles_post_ra>
